<compile_context>
chip_gen: v5e
topology: v5e:2x2
jax: 0.10.0
libtpu: 0.0.40
codegen_flags: <defaults>
</compile_context>

<pallas_src>
import numpy as np
import jax
import jax.numpy as jnp
from jax.experimental import pallas as pl
from jax.experimental.pallas import tpu as pltpu

# ---------------- config (small, consistent with BertConfig fields) ----------
HIDDEN = 32          # config.hidden_size
VOCAB = 100          # config.vocab_size
MAX_SEG = 3          # config.max_segment_embeddings
AGE_VOCAB = 120      # config.age_vocab_size
TYPE_VOCAB = 64      # config.type_vocab_size  (positional table size)
EPS = 1e-12          # layer_norm_eps
BATCH, SEQ = 2, 8

LANES = 128
assert LANES % HIDDEN == 0
PACK = LANES // HIDDEN      # tokens packed per lane-dense output row (4)
SEGC = 8                    # per-row stat columns (PACK padded to a sublane tile)
N_TABLES = 4                # word, age, posi, segment


def _round_up(x, m):
    return (int(x) + m - 1) // m * m


def _pick_tile_r(rows8: int) -> int:
    """Row tile: big enough to amortize per-step overhead (up to 512 rows =
    2048 tokens), but when there is enough work keep >= 2 balanced (even) grid
    steps so v7x's two TensorCores both get a share."""
    if rows8 <= 8:
        return rows8
    tile = min(512, _round_up((rows8 + 1) // 2, 8))
    steps = -(-rows8 // tile)
    if steps > 1 and steps % 2 == 1:          # re-balance to an even step count
        tile = _round_up(-(-rows8 // (steps + 1)), 8)
    return tile


def init_posi_embedding(max_position_embedding: int, hidden_size: int) -> np.ndarray:
    """Exact replica of BehrtEmbeddings._init_posi_embedding."""
    lookup = np.zeros((max_position_embedding, hidden_size), dtype=np.float32)
    pos = np.arange(max_position_embedding, dtype=np.float64)[:, None]
    idx = np.arange(hidden_size, dtype=np.float64)[None, :]
    ang = pos / np.power(10000.0, 2.0 * idx / hidden_size)
    lookup[:, 0::2] = np.sin(ang[:, 0::2])
    lookup[:, 1::2] = np.cos(ang[:, 1::2])
    return lookup.astype(np.float32)


# ------------------------------ Pallas kernel --------------------------------
def behrt_embeddings_kernel(ids_ref, tab_ref, segsum_ref, segbc1_ref, segbcg_ref,
                            beta_ref, out_ref):
    R, L = out_ref.shape                 # (TILE_R, 128) lane-dense output tile
    K = tab_ref.shape[0]                 # PACK * v_pad   (contraction dim)
    n_hot = ids_ref.shape[1]             # PACK * N_TABLES ids per dense row
    pack = n_hot // N_TABLES
    v_pad = K // pack

    ids = ids_ref[...]                                            # (R, n_hot) i32

    # Block-wise multi-hot: a single (1, v_pad) iota is reused (broadcast in
    # the compare) across all packed slots; per slot the 4 table hits are OR-ed
    # as boolean masks (tree-shaped) and converted to f32 once.  Column targets
    # within a slot are disjoint by construction (table offsets folded into the
    # ids in the wrapper), so OR == exact multi-hot.
    col = jax.lax.broadcasted_iota(jnp.int32, (1, v_pad), 1)
    blocks = []
    for k in range(pack):                                         # static unroll
        b = k * N_TABLES
        masks = [col == ids[:, b + j:b + j + 1] for j in range(N_TABLES)]
        while len(masks) > 1:                                     # tree-shaped OR
            nxt = [masks[i] | masks[i + 1] for i in range(0, len(masks) - 1, 2)]
            if len(masks) % 2:
                nxt.append(masks[-1])
            masks = nxt
        blocks.append(masks[0].astype(jnp.float32))               # (R, v_pad)
    hot = jnp.concatenate(blocks, axis=1)                         # (R, K)

    # Single fused embedding matmul -> PACK tokens per lane-dense 128-wide row.
    # (config.linear=False => a=b=c=d=1; scalar scales folded away.)
    emb = jnp.dot(hot, tab_ref[...], preferred_element_type=jnp.float32)      # (R, 128)

    # Two-pass LayerNorm via tiny segment matmuls (no reshapes, no cross-lane
    # shuffles).  1/H is folded into segsum_ref; gamma is folded into segbcg_ref.
    mean = jnp.dot(emb, segsum_ref[...], preferred_element_type=jnp.float32)       # (R, SEGC)
    mean_l = jnp.dot(mean, segbc1_ref[...], preferred_element_type=jnp.float32)    # (R, 128)
    cen = emb - mean_l
    var = jnp.dot(cen * cen, segsum_ref[...], preferred_element_type=jnp.float32)  # (R, SEGC)
    rstd = jax.lax.rsqrt(var + EPS)
    scale = jnp.dot(rstd, segbcg_ref[...], preferred_element_type=jnp.float32)     # (R, 128)

    # out = (emb - mean) * rstd * gamma + beta   (gamma already inside `scale`)
    out_ref[...] = cen * scale + beta_ref[...]
    # TODO(synk): nn.Dropout is identity in eval mode; training-mode dropout not implemented.


# ------------------------------ wrapper ---------------------------------------
def behrt_embeddings(input_ids, token_type_ids, age_ids, position_ids,
                     word_tab, seg_tab, age_tab, posi_tab, gamma, beta):
    B, T = input_ids.shape
    H = word_tab.shape[1]
    assert H == HIDDEN and LANES % H == 0
    N = B * T

    # ---- fused table: [word | age | posi | seg] along vocab, pad to 128-mult ----
    sizes = [word_tab.shape[0], age_tab.shape[0], posi_tab.shape[0], seg_tab.shape[0]]
    offs = np.concatenate([[0], np.cumsum(sizes)])[:N_TABLES].astype(np.int32)
    v_tot = int(sum(sizes))
    v_pad = _round_up(v_tot, 128)                     # align contraction to MXU tile
    fused = jnp.concatenate([word_tab, age_tab, posi_tab, seg_tab], axis=0).astype(jnp.float32)
    fused = jnp.pad(fused, ((0, v_pad - v_tot), (0, 0)))

    # Lane-dense block-diagonal table: packed slot k owns contraction rows
    # [k*v_pad, (k+1)*v_pad) and output lanes [k*H, (k+1)*H).
    dense_tab = jnp.zeros((PACK * v_pad, LANES), jnp.float32)
    for k in range(PACK):
        dense_tab = dense_tab.at[k * v_pad:(k + 1) * v_pad, k * H:(k + 1) * H].set(fused)

    # ---- packed id matrix: (rows, PACK*4) with table offsets folded in ----
    ids_tok = jnp.stack(
        [input_ids.reshape(-1), age_ids.reshape(-1),
         position_ids.reshape(-1), token_type_ids.reshape(-1)], axis=-1
    ).astype(jnp.int32) + jnp.asarray(offs, jnp.int32)[None, :]           # (N, 4)
    # TODO(synk): out-of-range ids silently miss every one-hot column (zero row)
    # instead of raising like torch nn.Embedding.

    rows = -(-N // PACK)                               # dense rows needed
    rows8 = _round_up(rows, 8)
    tile_r = _pick_tile_r(rows8)
    r_pad = _round_up(rows8, tile_r)
    n_pad = r_pad * PACK
    ids_tok = jnp.pad(ids_tok, ((0, n_pad - N), (0, 0)))   # padded tokens -> dropped later
    ids_dense = ids_tok.reshape(r_pad, PACK * N_TABLES)    # (r_pad, 16)

    # ---- LayerNorm stat matrices: 1/H folded into seg_sum, gamma into segbc_g ----
    seg_sum_np = np.zeros((LANES, SEGC), np.float32)     # reduce lanes -> per-token mean
    segbc_np = np.zeros((SEGC, LANES), np.float32)       # broadcast stat back to lanes
    for l in range(LANES):
        seg_sum_np[l, l // H] = 1.0 / H
        segbc_np[l // H, l] = 1.0
    seg_sum = jnp.asarray(seg_sum_np)
    segbc_1 = jnp.asarray(segbc_np)
    gamma_lane = jnp.tile(gamma.reshape(1, H).astype(jnp.float32), (1, PACK))   # (1, 128)
    segbc_g = segbc_1 * gamma_lane                                              # gamma folded
    beta_t = jnp.tile(beta.reshape(1, H).astype(jnp.float32), (1, PACK))        # (1, 128)

    # ---- cost estimate (helps XLA schedule around the custom call) ----
    steps = r_pad // tile_r
    K = PACK * v_pad
    cost = pl.CostEstimate(
        flops=int(steps * (2 * tile_r * K * LANES              # fused embedding matmul
                           + 4 * 2 * tile_r * SEGC * LANES     # 4 tiny LN stat matmuls
                           + 6 * tile_r * LANES)),              # elementwise epilogue
        transcendentals=int(steps * tile_r * SEGC),              # rsqrt
        bytes_accessed=int(4 * (ids_dense.size + r_pad * LANES + dense_tab.size
                                + seg_sum.size + segbc_1.size + segbc_g.size
                                + beta_t.size)),
    )

    const = lambda i: (0, 0)
    out = pl.pallas_call(
        behrt_embeddings_kernel,
        out_shape=jax.ShapeDtypeStruct((r_pad, LANES), jnp.float32),
        grid=(steps,),
        in_specs=[
            pl.BlockSpec((tile_r, PACK * N_TABLES), lambda i: (i, 0)),  # ids (tiled)
            # Constant index_maps: fetched once, VMEM-resident across the grid.
            # (v7x / production scaling: single-buffer these via
            #  pipeline_mode=pl.Buffered(1) and move the word table to HBM.)
            pl.BlockSpec(dense_tab.shape, const),                       # fused table
            pl.BlockSpec(seg_sum.shape, const),                         # lane->token sum (1/H)
            pl.BlockSpec(segbc_1.shape, const),                         # token->lane bcast
            pl.BlockSpec(segbc_g.shape, const),                         # bcast * gamma
            pl.BlockSpec((1, LANES), const),                            # beta (tiled x PACK)
        ],
        out_specs=pl.BlockSpec((tile_r, LANES), lambda i: (i, 0)),
        compiler_params=pltpu.CompilerParams(
            dimension_semantics=("parallel",)),        # shard rows across v7x's 2 TCs
        cost_estimate=cost,
    )(ids_dense, dense_tab, seg_sum, segbc_1, segbc_g, beta_t)

    # (r_pad, 128) row-major == (n_pad, H) row-major; drop padding tokens.
    return out.reshape(n_pad, H)[:N].reshape(B, T, H)


# ------------------------------ reference (pure JAX) ---------------------------
def behrt_embeddings_ref(input_ids, token_type_ids, age_ids, position_ids,
                         word_tab, seg_tab, age_tab, posi_tab, gamma, beta):
    emb = word_tab[input_ids]
    emb = emb + age_tab[age_ids]
    emb = emb + posi_tab[position_ids]
    emb = emb + seg_tab[token_type_ids]
    mean = jnp.mean(emb, axis=-1, keepdims=True)
    var = jnp.mean((emb - mean) ** 2, axis=-1, keepdims=True)
    return (emb - mean) * jax.lax.rsqrt(var + EPS) * gamma + beta


if __name__ == "__main__":
    key = jax.random.PRNGKey(0)
    k1, k2, k3, k4, k5, k6, k7, k8 = jax.random.split(key, 8)

    # deterministic "parameters"
    word_tab = (0.02 * jax.random.normal(k1, (VOCAB, HIDDEN))).astype(jnp.float32)
    seg_tab = (0.02 * jax.random.normal(k2, (MAX_SEG, HIDDEN))).astype(jnp.float32)
    age_tab = (0.02 * jax.random.normal(k3, (AGE_VOCAB, HIDDEN))).astype(jnp.float32)
    posi_tab = jnp.asarray(init_posi_embedding(TYPE_VOCAB, HIDDEN))
    gamma = (1.0 + 0.1 * jax.random.normal(k7, (HIDDEN,))).astype(jnp.float32)
    beta = (0.1 * jax.random.normal(k8, (HIDDEN,))).astype(jnp.float32)

    # deterministic inputs
    input_ids = jax.random.randint(k4, (BATCH, SEQ), 0, VOCAB, dtype=jnp.int32)
    token_type_ids = jax.random.randint(k5, (BATCH, SEQ), 0, MAX_SEG, dtype=jnp.int32)
    age_ids = jax.random.randint(k6, (BATCH, SEQ), 0, AGE_VOCAB, dtype=jnp.int32)
    position_ids = jnp.broadcast_to(jnp.arange(SEQ, dtype=jnp.int32), (BATCH, SEQ))

    out = behrt_embeddings(input_ids, token_type_ids, age_ids, position_ids,
                           word_tab, seg_tab, age_tab, posi_tab, gamma, beta)
    out = jax.block_until_ready(out)

    ref = behrt_embeddings_ref(input_ids, token_type_ids, age_ids, position_ids,
                               word_tab, seg_tab, age_tab, posi_tab, gamma, beta)
    np.testing.assert_allclose(np.asarray(out), np.asarray(ref), rtol=1e-5, atol=1e-5)

    print("KERNEL_OK")
</pallas_src>

<mosaic_0001>
module attributes {stable_mosaic.version = 11 : i64} {
  func.func @behrt_embeddings_kernel(%arg0: i32, %arg1: memref<8x16xi32, #tpu.memory_space<vmem>>, %arg2: memref<1536x128xf32, #tpu.memory_space<vmem>>, %arg3: memref<128x8xf32, #tpu.memory_space<vmem>>, %arg4: memref<8x128xf32, #tpu.memory_space<vmem>>, %arg5: memref<8x128xf32, #tpu.memory_space<vmem>>, %arg6: memref<1x128xf32, #tpu.memory_space<vmem>>, %arg7: memref<8x128xf32, #tpu.memory_space<vmem>>) attributes {dimension_semantics = [#tpu.dimension_semantics<parallel>], iteration_bounds = array<i64: 1>, scalar_prefetch = 0 : i64, scratch_operands = 0 : i64, tpu.core_type = #tpu.core_type<tc>, window_params = [{transform_indices = @transform_0, window_bounds = array<i64: 8, 16>}, {pipeline_mode = #tpu.pipeline_mode<synchronous>, transform_indices = @transform_1, window_bounds = array<i64: 1536, 128>}, {pipeline_mode = #tpu.pipeline_mode<synchronous>, transform_indices = @transform_2, window_bounds = array<i64: 128, 8>}, {pipeline_mode = #tpu.pipeline_mode<synchronous>, transform_indices = @transform_3, window_bounds = array<i64: 8, 128>}, {pipeline_mode = #tpu.pipeline_mode<synchronous>, transform_indices = @transform_4, window_bounds = array<i64: 8, 128>}, {pipeline_mode = #tpu.pipeline_mode<synchronous>, transform_indices = @transform_5, window_bounds = array<i64: 1, 128>}, {transform_indices = @transform_6, window_bounds = array<i64: 8, 128>}]} {
    %c0 = arith.constant 0 : index
    %c0_0 = arith.constant 0 : index
    %0 = vector.load %arg1[%c0, %c0_0] : memref<8x16xi32, #tpu.memory_space<vmem>>, vector<8x16xi32>
    %1 = tpu.iota {dimensions = array<i32: 1>} : vector<1x384xi32>
    %2 = vector.extract_strided_slice %0 {offsets = [0, 0], sizes = [8, 1], strides = [1, 1]} : vector<8x16xi32> to vector<8x1xi32>
    %3 = vector.broadcast %1 : vector<1x384xi32> to vector<8x384xi32>
    %4 = vector.broadcast %2 : vector<8x1xi32> to vector<8x384xi32>
    %5 = arith.cmpi eq, %3, %4 : vector<8x384xi32>
    %6 = vector.extract_strided_slice %0 {offsets = [0, 1], sizes = [8, 1], strides = [1, 1]} : vector<8x16xi32> to vector<8x1xi32>
    %7 = vector.broadcast %1 : vector<1x384xi32> to vector<8x384xi32>
    %8 = vector.broadcast %6 : vector<8x1xi32> to vector<8x384xi32>
    %9 = arith.cmpi eq, %7, %8 : vector<8x384xi32>
    %10 = vector.extract_strided_slice %0 {offsets = [0, 2], sizes = [8, 1], strides = [1, 1]} : vector<8x16xi32> to vector<8x1xi32>
    %11 = vector.broadcast %1 : vector<1x384xi32> to vector<8x384xi32>
    %12 = vector.broadcast %10 : vector<8x1xi32> to vector<8x384xi32>
    %13 = arith.cmpi eq, %11, %12 : vector<8x384xi32>
    %14 = vector.extract_strided_slice %0 {offsets = [0, 3], sizes = [8, 1], strides = [1, 1]} : vector<8x16xi32> to vector<8x1xi32>
    %15 = vector.broadcast %1 : vector<1x384xi32> to vector<8x384xi32>
    %16 = vector.broadcast %14 : vector<8x1xi32> to vector<8x384xi32>
    %17 = arith.cmpi eq, %15, %16 : vector<8x384xi32>
    %18 = arith.ori %5, %9 : vector<8x384xi1>
    %19 = arith.ori %13, %17 : vector<8x384xi1>
    %20 = arith.ori %18, %19 : vector<8x384xi1>
    %21 = arith.extui %20 : vector<8x384xi1> to vector<8x384xi32>
    %22 = arith.sitofp %21 : vector<8x384xi32> to vector<8x384xf32>
    %23 = vector.extract_strided_slice %0 {offsets = [0, 4], sizes = [8, 1], strides = [1, 1]} : vector<8x16xi32> to vector<8x1xi32>
    %24 = vector.broadcast %1 : vector<1x384xi32> to vector<8x384xi32>
    %25 = vector.broadcast %23 : vector<8x1xi32> to vector<8x384xi32>
    %26 = arith.cmpi eq, %24, %25 : vector<8x384xi32>
    %27 = vector.extract_strided_slice %0 {offsets = [0, 5], sizes = [8, 1], strides = [1, 1]} : vector<8x16xi32> to vector<8x1xi32>
    %28 = vector.broadcast %1 : vector<1x384xi32> to vector<8x384xi32>
    %29 = vector.broadcast %27 : vector<8x1xi32> to vector<8x384xi32>
    %30 = arith.cmpi eq, %28, %29 : vector<8x384xi32>
    %31 = vector.extract_strided_slice %0 {offsets = [0, 6], sizes = [8, 1], strides = [1, 1]} : vector<8x16xi32> to vector<8x1xi32>
    %32 = vector.broadcast %1 : vector<1x384xi32> to vector<8x384xi32>
    %33 = vector.broadcast %31 : vector<8x1xi32> to vector<8x384xi32>
    %34 = arith.cmpi eq, %32, %33 : vector<8x384xi32>
    %35 = vector.extract_strided_slice %0 {offsets = [0, 7], sizes = [8, 1], strides = [1, 1]} : vector<8x16xi32> to vector<8x1xi32>
    %36 = vector.broadcast %1 : vector<1x384xi32> to vector<8x384xi32>
    %37 = vector.broadcast %35 : vector<8x1xi32> to vector<8x384xi32>
    %38 = arith.cmpi eq, %36, %37 : vector<8x384xi32>
    %39 = arith.ori %26, %30 : vector<8x384xi1>
    %40 = arith.ori %34, %38 : vector<8x384xi1>
    %41 = arith.ori %39, %40 : vector<8x384xi1>
    %42 = arith.extui %41 : vector<8x384xi1> to vector<8x384xi32>
    %43 = arith.sitofp %42 : vector<8x384xi32> to vector<8x384xf32>
    %44 = vector.extract_strided_slice %0 {offsets = [0, 8], sizes = [8, 1], strides = [1, 1]} : vector<8x16xi32> to vector<8x1xi32>
    %45 = vector.broadcast %1 : vector<1x384xi32> to vector<8x384xi32>
    %46 = vector.broadcast %44 : vector<8x1xi32> to vector<8x384xi32>
    %47 = arith.cmpi eq, %45, %46 : vector<8x384xi32>
    %48 = vector.extract_strided_slice %0 {offsets = [0, 9], sizes = [8, 1], strides = [1, 1]} : vector<8x16xi32> to vector<8x1xi32>
    %49 = vector.broadcast %1 : vector<1x384xi32> to vector<8x384xi32>
    %50 = vector.broadcast %48 : vector<8x1xi32> to vector<8x384xi32>
    %51 = arith.cmpi eq, %49, %50 : vector<8x384xi32>
    %52 = vector.extract_strided_slice %0 {offsets = [0, 10], sizes = [8, 1], strides = [1, 1]} : vector<8x16xi32> to vector<8x1xi32>
    %53 = vector.broadcast %1 : vector<1x384xi32> to vector<8x384xi32>
    %54 = vector.broadcast %52 : vector<8x1xi32> to vector<8x384xi32>
    %55 = arith.cmpi eq, %53, %54 : vector<8x384xi32>
    %56 = vector.extract_strided_slice %0 {offsets = [0, 11], sizes = [8, 1], strides = [1, 1]} : vector<8x16xi32> to vector<8x1xi32>
    %57 = vector.broadcast %1 : vector<1x384xi32> to vector<8x384xi32>
    %58 = vector.broadcast %56 : vector<8x1xi32> to vector<8x384xi32>
    %59 = arith.cmpi eq, %57, %58 : vector<8x384xi32>
    %60 = arith.ori %47, %51 : vector<8x384xi1>
    %61 = arith.ori %55, %59 : vector<8x384xi1>
    %62 = arith.ori %60, %61 : vector<8x384xi1>
    %63 = arith.extui %62 : vector<8x384xi1> to vector<8x384xi32>
    %64 = arith.sitofp %63 : vector<8x384xi32> to vector<8x384xf32>
    %65 = vector.extract_strided_slice %0 {offsets = [0, 12], sizes = [8, 1], strides = [1, 1]} : vector<8x16xi32> to vector<8x1xi32>
    %66 = vector.broadcast %1 : vector<1x384xi32> to vector<8x384xi32>
    %67 = vector.broadcast %65 : vector<8x1xi32> to vector<8x384xi32>
    %68 = arith.cmpi eq, %66, %67 : vector<8x384xi32>
    %69 = vector.extract_strided_slice %0 {offsets = [0, 13], sizes = [8, 1], strides = [1, 1]} : vector<8x16xi32> to vector<8x1xi32>
    %70 = vector.broadcast %1 : vector<1x384xi32> to vector<8x384xi32>
    %71 = vector.broadcast %69 : vector<8x1xi32> to vector<8x384xi32>
    %72 = arith.cmpi eq, %70, %71 : vector<8x384xi32>
    %73 = vector.extract_strided_slice %0 {offsets = [0, 14], sizes = [8, 1], strides = [1, 1]} : vector<8x16xi32> to vector<8x1xi32>
    %74 = vector.broadcast %1 : vector<1x384xi32> to vector<8x384xi32>
    %75 = vector.broadcast %73 : vector<8x1xi32> to vector<8x384xi32>
    %76 = arith.cmpi eq, %74, %75 : vector<8x384xi32>
    %77 = vector.extract_strided_slice %0 {offsets = [0, 15], sizes = [8, 1], strides = [1, 1]} : vector<8x16xi32> to vector<8x1xi32>
    %78 = vector.broadcast %1 : vector<1x384xi32> to vector<8x384xi32>
    %79 = vector.broadcast %77 : vector<8x1xi32> to vector<8x384xi32>
    %80 = arith.cmpi eq, %78, %79 : vector<8x384xi32>
    %81 = arith.ori %68, %72 : vector<8x384xi1>
    %82 = arith.ori %76, %80 : vector<8x384xi1>
    %83 = arith.ori %81, %82 : vector<8x384xi1>
    %84 = arith.extui %83 : vector<8x384xi1> to vector<8x384xi32>
    %85 = arith.sitofp %84 : vector<8x384xi32> to vector<8x384xf32>
    %86 = tpu.concatenate %22, %43, %64, %85 in 1 : vector<8x384xf32>, vector<8x384xf32>, vector<8x384xf32>, vector<8x384xf32> -> vector<8x1536xf32>
    %c0_1 = arith.constant 0 : index
    %c0_2 = arith.constant 0 : index
    %87 = vector.load %arg2[%c0_1, %c0_2] : memref<1536x128xf32, #tpu.memory_space<vmem>>, vector<1536x128xf32>
    %cst = arith.constant dense<0.000000e+00> : vector<8x128xf32>
    %88 = tpu.matmul %86, %87, %cst {dimension_numbers = #tpu.dot_dimension_numbers<[1], [0], [0], [1], [0, 0, 1, 1], [], []>} : vector<8x1536xf32>, vector<1536x128xf32>, vector<8x128xf32> -> vector<8x128xf32>
    %c0_3 = arith.constant 0 : index
    %c0_4 = arith.constant 0 : index
    %89 = vector.load %arg3[%c0_3, %c0_4] : memref<128x8xf32, #tpu.memory_space<vmem>>, vector<128x8xf32>
    %cst_5 = arith.constant dense<0.000000e+00> : vector<8x8xf32>
    %90 = tpu.matmul %88, %89, %cst_5 {dimension_numbers = #tpu.dot_dimension_numbers<[1], [0], [0], [1], [0, 0, 1, 1], [], []>} : vector<8x128xf32>, vector<128x8xf32>, vector<8x8xf32> -> vector<8x8xf32>
    %c0_6 = arith.constant 0 : index
    %c0_7 = arith.constant 0 : index
    %91 = vector.load %arg4[%c0_6, %c0_7] : memref<8x128xf32, #tpu.memory_space<vmem>>, vector<8x128xf32>
    %cst_8 = arith.constant dense<0.000000e+00> : vector<8x128xf32>
    %92 = tpu.matmul %90, %91, %cst_8 {dimension_numbers = #tpu.dot_dimension_numbers<[1], [0], [0], [1], [0, 0, 1, 1], [], []>} : vector<8x8xf32>, vector<8x128xf32>, vector<8x128xf32> -> vector<8x128xf32>
    %93 = arith.subf %88, %92 : vector<8x128xf32>
    %94 = arith.mulf %93, %93 : vector<8x128xf32>
    %c0_9 = arith.constant 0 : index
    %c0_10 = arith.constant 0 : index
    %95 = vector.load %arg3[%c0_9, %c0_10] : memref<128x8xf32, #tpu.memory_space<vmem>>, vector<128x8xf32>
    %cst_11 = arith.constant dense<0.000000e+00> : vector<8x8xf32>
    %96 = tpu.matmul %94, %95, %cst_11 {dimension_numbers = #tpu.dot_dimension_numbers<[1], [0], [0], [1], [0, 0, 1, 1], [], []>} : vector<8x128xf32>, vector<128x8xf32>, vector<8x8xf32> -> vector<8x8xf32>
    %cst_12 = arith.constant 9.99999996E-13 : f32
    %97 = vector.broadcast %cst_12 : f32 to vector<8x8xf32>
    %98 = arith.addf %96, %97 : vector<8x8xf32>
    %99 = math.rsqrt %98 : vector<8x8xf32>
    %c0_13 = arith.constant 0 : index
    %c0_14 = arith.constant 0 : index
    %100 = vector.load %arg5[%c0_13, %c0_14] : memref<8x128xf32, #tpu.memory_space<vmem>>, vector<8x128xf32>
    %cst_15 = arith.constant dense<0.000000e+00> : vector<8x128xf32>
    %101 = tpu.matmul %99, %100, %cst_15 {dimension_numbers = #tpu.dot_dimension_numbers<[1], [0], [0], [1], [0, 0, 1, 1], [], []>} : vector<8x8xf32>, vector<8x128xf32>, vector<8x128xf32> -> vector<8x128xf32>
    %102 = arith.mulf %93, %101 : vector<8x128xf32>
    %c0_16 = arith.constant 0 : index
    %c0_17 = arith.constant 0 : index
    %103 = vector.load %arg6[%c0_16, %c0_17] : memref<1x128xf32, #tpu.memory_space<vmem>>, vector<1x128xf32>
    %104 = vector.broadcast %103 : vector<1x128xf32> to vector<8x128xf32>
    %105 = arith.addf %102, %104 : vector<8x128xf32>
    %c0_18 = arith.constant 0 : index
    %c0_19 = arith.constant 0 : index
    %106 = vector.load %arg7[%c0_18, %c0_19] : memref<8x128xf32, #tpu.memory_space<vmem>>, vector<8x128xf32>
    tpu.vector_store %arg7[%c0_18, %c0_19], %105 {strides = array<i32>} : memref<8x128xf32, #tpu.memory_space<vmem>>, vector<8x128xf32>,
    return
  }
  func.func @transform_0(%arg0: i32) -> (i32, i32) {
    %c0_i32 = arith.constant 0 : i32
    %c0_i32_0 = arith.constant 0 : i32
    return %arg0, %c0_i32 : i32, i32
  }
  func.func @transform_1(%arg0: i32) -> (i32, i32) {
    %c0_i32 = arith.constant 0 : i32
    %c0_i32_0 = arith.constant 0 : i32
    %c0_i32_1 = arith.constant 0 : i32
    return %c0_i32, %c0_i32_0 : i32, i32
  }
  func.func @transform_2(%arg0: i32) -> (i32, i32) {
    %c0_i32 = arith.constant 0 : i32
    %c0_i32_0 = arith.constant 0 : i32
    %c0_i32_1 = arith.constant 0 : i32
    return %c0_i32, %c0_i32_0 : i32, i32
  }
  func.func @transform_3(%arg0: i32) -> (i32, i32) {
    %c0_i32 = arith.constant 0 : i32
    %c0_i32_0 = arith.constant 0 : i32
    %c0_i32_1 = arith.constant 0 : i32
    return %c0_i32, %c0_i32_0 : i32, i32
  }
  func.func @transform_4(%arg0: i32) -> (i32, i32) {
    %c0_i32 = arith.constant 0 : i32
    %c0_i32_0 = arith.constant 0 : i32
    %c0_i32_1 = arith.constant 0 : i32
    return %c0_i32, %c0_i32_0 : i32, i32
  }
  func.func @transform_5(%arg0: i32) -> (i32, i32) {
    %c0_i32 = arith.constant 0 : i32
    %c0_i32_0 = arith.constant 0 : i32
    %c0_i32_1 = arith.constant 0 : i32
    return %c0_i32, %c0_i32_0 : i32, i32
  }
  func.func @transform_6(%arg0: i32) -> (i32, i32) {
    %c0_i32 = arith.constant 0 : i32
    %c0_i32_0 = arith.constant 0 : i32
    return %arg0, %c0_i32 : i32, i32
  }
}

</mosaic_0001>

<bundles_post_ra>
// kernel: tpu_custom_call.1
= control target key start
LH: loop header
LB: loop body
LE: loop exit
PB: predicated region body
PF: predicated region fallthrough
CT: control target
= control target key end

     0   :  { %11 = vsyncpa [#allocation3], 0  ;;  %s1266_s0 = inlined_call_operand.vmem [shape: s32[8,16], index: 0, kind: input, shape index: {}]   ;;  %s1267_s1 = inlined_call_operand.hbm [shape: f32[1536,128], index: 1, kind: input, shape index: {}]   ;;  %s1268_s2 = inlined_call_operand.vmem [shape: f32[128,8], index: 2, kind: input, shape index: {}]   ;;  %s1269_s3 = inlined_call_operand.vmem [shape: f32[8,128], index: 3, kind: input, shape index: {}]   ;;  %s1270_s4 = inlined_call_operand.vmem [shape: f32[8,128], index: 4, kind: input, shape index: {}]   ;;  %s1271_s5 = inlined_call_operand.vmem [shape: f32[1,128], index: 5, kind: input, shape index: {}]   ;;  %s1272_s6 = inlined_call_operand.hbm [shape: f32[8,128], index: 6, kind: output, shape index: {}]  }
   0x1   :  { %12 = vsyncpa [#allocation4], 0  ;;  %s19_s23 = sshll.u32 %s1267_s1, 4  ;;  %s893_s24 = smov [#allocation2]   ;;  %s20_s23 = int_to_ptr.hbm [resolvable:$true] %s19_s23 }
   0x2   :  { %s21_s25 = sshll.u32 %s893_s24, 4  ;;  %s894_s26 = smov 128   ;;  %s22_s25 = int_to_ptr.vmem [resolvable:$true] %s21_s25 }
   0x3   :  { %s895_s27 = smov 8  }
   0x4   :  { %27 = dma.hbm_to_vmem [thread:$0]  %s20_s23, 24576, %s22_s25, [#allocation3], %s894_s26, %s894_s26, %s895_s27  }
   0x5   :  { %889 = dma.done.wait [#allocation3], 24576  }
   0x6   :  { %890 = vsyncadd [#allocation3], 4294942720  ;;  %v896_v0 = vmov 2   ;;  %v897_v1 = vmov 0   ;;  %v898_v2 = vmov 4   ;;  %v955_v3 = vld [vmem:[%s1266_s0] sm:$0xff] }
   0x7   :  { %823 = vset.pattern.permute.xlu1 %v896_v0  ;;  %821 = vset.pattern.permute.xlu0 %v897_v1  ;;  %v899_v4 = vmov 3   ;;  %v900_v5 = vmov 1   ;;  %v901_v6 = vmov 5   ;;  %v216_v7 = vld [vmem:[#allocation2 + $0x78] sm:$0xff]  ;;  %v215_v8 = vld [vmem:[#allocation2 + $0x70] sm:$0xff]  ;;  %v214_v10 = vld [vmem:[#allocation2 + $0x68] sm:$0xff] }
   0x8   :  { %825 = vset.pattern.permute.xlu2 %v898_v2  ;;  %58 = vperm.xlu1 %823, %v955_v3   ;;  %v232_v9 = vld [vmem:[#allocation2 + $0xf8] sm:$0xff]  ;;  %v902_v11 = vmov 6   ;;  %v903_v12 = vmov 8   ;;  %v213_v14 = vld [vmem:[#allocation2 + $0x60] sm:$0xff]  ;;  %v231_v15 = vld [vmem:[#allocation2 + $0xf0] sm:$0xff]  ;;  %v904_v16 = vmov 7  }
   0x9   :  { %46 = vperm.xlu0 %821, %v955_v3   ;;  %85 = vperm.xlu2 %825, %v955_v3   ;;  %v248_v13 = vld [vmem:[#allocation2 + $0x178] sm:$0xff]  ;;  %v247_v17 = vld [vmem:[#allocation2 + $0x170] sm:$0xff]  ;;  %v230_v20 = vld [vmem:[#allocation2 + $0xe8] sm:$0xff]  ;;  %v905_v26 = vmov 9   ;;  %v906_v27 = vmov 13   ;;  %v907_v31 = vmov 10  }
   0xa   :  { %393 = vmatpush.msra.mxu0 %v216_v7  ;;  %413 = vmatpush.msra.mxu1 %v232_v9  ;;  %v264_v18 = vld [vmem:[#allocation2 + $0x1f8] sm:$0xff]  ;;  %v246_v21 = vld [vmem:[#allocation2 + $0x168] sm:$0xff]  ;;  %v263_v22 = vld [vmem:[#allocation2 + $0x1f0] sm:$0xff]  ;;  %v908_v43 = vmov 11   ;;  %v909_v47 = vmov 12   ;;  %v910_v59 = vmov 14  }
   0xb   :  { %433 = vmatpush.msra.mxu2 %v248_v13  ;;  %v212_v19 = vld [vmem:[#allocation2 + $0x58] sm:$0xff]  ;;  %453 = vmatpush.msra.mxu3 %v264_v18  ;;  %v211_v23 = vld [vmem:[#allocation2 + $0x50] sm:$0xff]  ;;  %v229_v24 = vld [vmem:[#allocation2 + $0xe0] sm:$0xff]  ;;  %v911_v63 = vmov 15   ;;  %s764_s17 = sshll.u32 %s1272_s6, 4  ;;  %s765_s17 = int_to_ptr.hbm [resolvable:$true] %s764_s17 }
   0xc   :  { %394 = vmatpush.msra.mxu0 %v215_v8  ;;  %414 = vmatpush.msra.mxu1 %v231_v15  ;;  %v245_v25 = vld [vmem:[#allocation2 + $0x160] sm:$0xff]  ;;  %v210_v28 = vld [vmem:[#allocation2 + $0x48] sm:$0xff]  ;;  %v228_v29 = vld [vmem:[#allocation2 + $0xd8] sm:$0xff] }
   0xd   :  { %434 = vmatpush.msra.mxu2 %v247_v17  ;;  %454 = vmatpush.msra.mxu3 %v263_v22  ;;  %v244_v30 = vld [vmem:[#allocation2 + $0x158] sm:$0xff]  ;;  %v262_v32 = vld [vmem:[#allocation2 + $0x1e8] sm:$0xff]  ;;  %v209_v33 = vld [vmem:[#allocation2 + $0x40] sm:$0xff] }
   0xe   :  { %395 = vmatpush.msra.mxu0 %v214_v10  ;;  %415 = vmatpush.msra.mxu1 %v230_v20  ;;  %v227_v34 = vld [vmem:[#allocation2 + $0xd0] sm:$0xff]  ;;  %v261_v36 = vld [vmem:[#allocation2 + $0x1e0] sm:$0xff]  ;;  %v208_v37 = vld [vmem:[#allocation2 + $0x38] sm:$0xff] }
   0xf   :  { %435 = vmatpush.msra.mxu2 %v246_v21  ;;  %v243_v35 = vld [vmem:[#allocation2 + $0x150] sm:$0xff]  ;;  %455 = vmatpush.msra.mxu3 %v262_v32  ;;  %v226_v38 = vld [vmem:[#allocation2 + $0xc8] sm:$0xff]  ;;  %v260_v40 = vld [vmem:[#allocation2 + $0x1d8] sm:$0xff] }
  0x10   :  { %824 = vset.pattern.permute.xlu1 %v899_v4  ;;  %396 = vmatpush.msra.mxu0 %v213_v14  ;;  %v242_v39 = vld [vmem:[#allocation2 + $0x148] sm:$0xff]  ;;  %v207_v41 = vld [vmem:[#allocation2 + $0x30] sm:$0xff]  ;;  %v225_v42 = vld [vmem:[#allocation2 + $0xc0] sm:$0xff] }
  0x11   :  { %822 = vset.pattern.permute.xlu0 %v900_v5  ;;  %64 = vperm.xlu1 %824, %v955_v3   ;;  %v241_v44 = vld [vmem:[#allocation2 + $0x140] sm:$0xff]  ;;  %v259_v45 = vld [vmem:[#allocation2 + $0x1d0] sm:$0xff]  ;;  %v206_v46 = vld [vmem:[#allocation2 + $0x28] sm:$0xff] }
  0x12   :  { %52 = vperm.xlu0 %822, %v955_v3   ;;  %826 = vset.pattern.permute.xlu2 %v901_v6  ;;  %v224_v48 = vld [vmem:[#allocation2 + $0xb8] sm:$0xff]  ;;  %v258_v50 = vld [vmem:[#allocation2 + $0x1c8] sm:$0xff]  ;;  %v205_v51 = vld [vmem:[#allocation2 + $0x20] sm:$0xff] }
  0x13   :  { %91 = vperm.xlu2 %826, %v955_v3   ;;  %397 = vmatpush.msra.mxu0 %v212_v19  ;;  %v240_v49 = vld [vmem:[#allocation2 + $0x138] sm:$0xff]  ;;  %v223_v52 = vld [vmem:[#allocation2 + $0xb0] sm:$0xff]  ;;  %v257_v54 = vld [vmem:[#allocation2 + $0x1c0] sm:$0xff] }
  0x14   :  { %416 = vmatpush.msra.mxu1 %v229_v24  ;;  %436 = vmatpush.msra.mxu2 %v245_v25  ;;  %v239_v53 = vld [vmem:[#allocation2 + $0x130] sm:$0xff]  ;;  %v204_v55 = vld [vmem:[#allocation2 + $0x18] sm:$0xff]  ;;  %v222_v56 = vld [vmem:[#allocation2 + $0xa8] sm:$0xff] }
  0x15   :  { %398 = vmatpush.msra.mxu0 %v211_v23  ;;  %456 = vmatpush.msra.mxu3 %v261_v36  ;;  %v238_v57 = vld [vmem:[#allocation2 + $0x128] sm:$0xff]  ;;  %v256_v58 = vld [vmem:[#allocation2 + $0x1b8] sm:$0xff]  ;;  %v203_v60 = vld [vmem:[#allocation2 + $0x10] sm:$0xff] }
  0x16   :  { %417 = vmatpush.msra.mxu1 %v228_v29  ;;  %437 = vmatpush.msra.mxu2 %v244_v30  ;;  %v221_v61 = vld [vmem:[#allocation2 + $0xa0] sm:$0xff]  ;;  %v255_v0 = vld [vmem:[#allocation2 + $0x1b0] sm:$0xff]  ;;  %v202_v1 = vld [vmem:[#allocation2 + $0x8] sm:$0xff] }
  0x17   :  { %399 = vmatpush.msra.mxu0 %v210_v28  ;;  %457 = vmatpush.msra.mxu3 %v260_v40  ;;  %v237_v62 = vld [vmem:[#allocation2 + $0x120] sm:$0xff]  ;;  %v220_v2 = vld [vmem:[#allocation2 + $0x98] sm:$0xff]  ;;  %v254_v5 = vld [vmem:[#allocation2 + $0x1a8] sm:$0xff] }
  0x18   :  { %418 = vmatpush.msra.mxu1 %v227_v34  ;;  %438 = vmatpush.msra.mxu2 %v243_v35  ;;  %v236_v4 = vld [vmem:[#allocation2 + $0x118] sm:$0xff]  ;;  %v201_v6 = vld [vmem:[#allocation2] sm:$0xff]  ;;  %v219_v7 = vld [vmem:[#allocation2 + $0x90] sm:$0xff] }
  0x19   :  { %827 = vset.pattern.permute.xlu1 %v902_v11  ;;  %400 = vmatpush.msra.mxu0 %v209_v33  ;;  %v235_v8 = vld [vmem:[#allocation2 + $0x110] sm:$0xff]  ;;  %v253_v9 = vld [vmem:[#allocation2 + $0x1a0] sm:$0xff]  ;;  %v280_v10 = vld [vmem:[#allocation2 + $0x278] sm:$0xff] }
  0x1a   :  { %829 = vset.pattern.permute.xlu0 %v903_v12  ;;  %97 = vperm.xlu1 %827, %v955_v3   ;;  %v218_v11 = vld [vmem:[#allocation2 + $0x88] sm:$0xff]  ;;  %v279_v13 = vld [vmem:[#allocation2 + $0x270] sm:$0xff]  ;;  %v217_v14 = vld [vmem:[#allocation2 + $0x80] sm:$0xff] }
  0x1b   :  { %124 = vperm.xlu0 %829, %v955_v3   ;;  %828 = vset.pattern.permute.xlu2 %v904_v16  ;;  %v234_v12 = vld [vmem:[#allocation2 + $0x108] sm:$0xff]  ;;  %v233_v15 = vld [vmem:[#allocation2 + $0x100] sm:$0xff]  ;;  %v251_v16 = vld [vmem:[#allocation2 + $0x190] sm:$0xff] }
  0x1c   :  { %103 = vperm.xlu2 %828, %v955_v3   ;;  %401 = vmatpush.msra.mxu0 %v208_v37  ;;  %v278_v17 = vld [vmem:[#allocation2 + $0x268] sm:$0xff]  ;;  %v296_v18 = vld [vmem:[#allocation2 + $0x2f8] sm:$0xff]  ;;  %v277_v21 = vld [vmem:[#allocation2 + $0x260] sm:$0xff] }
  0x1d   :  { %419 = vmatpush.msra.mxu1 %v226_v38  ;;  %439 = vmatpush.msra.mxu2 %v242_v39  ;;  %v312_v19 = vld [vmem:[#allocation2 + $0x378] sm:$0xff]  ;;  %v250_v20 = vld [vmem:[#allocation2 + $0x188] sm:$0xff]  ;;  %v295_v22 = vld [vmem:[#allocation2 + $0x2f0] sm:$0xff] }
  0x1e   :  { %402 = vmatpush.msra.mxu0 %v207_v41  ;;  %458 = vmatpush.msra.mxu3 %v259_v45  ;;  %v311_v23 = vld [vmem:[#allocation2 + $0x370] sm:$0xff]  ;;  %v249_v24 = vld [vmem:[#allocation2 + $0x180] sm:$0xff]  ;;  %v276_v25 = vld [vmem:[#allocation2 + $0x258] sm:$0xff] }
  0x1f   :  { %420 = vmatpush.msra.mxu1 %v225_v42  ;;  %440 = vmatpush.msra.mxu2 %v241_v44  ;;  %v328_v28 = vld [vmem:[#allocation2 + $0x3f8] sm:$0xff]  ;;  %v275_v29 = vld [vmem:[#allocation2 + $0x250] sm:$0xff]  ;;  %v293_v30 = vld [vmem:[#allocation2 + $0x2e0] sm:$0xff] }
  0x20   :  { %403 = vmatpush.msra.mxu0 %v206_v46  ;;  %459 = vmatpush.msra.mxu3 %v258_v50  ;;  %v327_v32 = vld [vmem:[#allocation2 + $0x3f0] sm:$0xff]  ;;  %v274_v33 = vld [vmem:[#allocation2 + $0x248] sm:$0xff]  ;;  %v292_v34 = vld [vmem:[#allocation2 + $0x2d8] sm:$0xff] }
  0x21   :  { %421 = vmatpush.msra.mxu1 %v224_v48  ;;  %441 = vmatpush.msra.mxu2 %v240_v49  ;;  %v308_v35 = vld [vmem:[#allocation2 + $0x358] sm:$0xff]  ;;  %v326_v36 = vld [vmem:[#allocation2 + $0x3e8] sm:$0xff]  ;;  %v273_v37 = vld [vmem:[#allocation2 + $0x240] sm:$0xff] }
  0x22   :  { %830 = vset.pattern.permute.xlu1 %v905_v26  ;;  %404 = vmatpush.msra.mxu0 %v205_v51  ;;  %v294_v26 = vld [vmem:[#allocation2 + $0x2e8] sm:$0xff]  ;;  %v291_v38 = vld [vmem:[#allocation2 + $0x2d0] sm:$0xff]  ;;  %v325_v40 = vld [vmem:[#allocation2 + $0x3e0] sm:$0xff] }
  0x23   :  { %834 = vset.pattern.permute.xlu0 %v906_v27  ;;  %130 = vperm.xlu1 %830, %v955_v3   ;;  %v310_v27 = vld [vmem:[#allocation2 + $0x368] sm:$0xff]  ;;  %v307_v39 = vld [vmem:[#allocation2 + $0x350] sm:$0xff]  ;;  %v272_v41 = vld [vmem:[#allocation2 + $0x238] sm:$0xff] }
  0x24   :  { %169 = vperm.xlu0 %834, %v955_v3   ;;  %831 = vset.pattern.permute.xlu2 %v907_v31  ;;  %v309_v31 = vld [vmem:[#allocation2 + $0x360] sm:$0xff]  ;;  %v290_v42 = vld [vmem:[#allocation2 + $0x2c8] sm:$0xff]  ;;  %v324_v44 = vld [vmem:[#allocation2 + $0x3d8] sm:$0xff] }
  0x25   :  { %136 = vperm.xlu2 %831, %v955_v3   ;;  %422 = vmatpush.msra.mxu1 %v223_v52  ;;  %v271_v45 = vld [vmem:[#allocation2 + $0x230] sm:$0xff]  ;;  %v289_v46 = vld [vmem:[#allocation2 + $0x2c0] sm:$0xff]  ;;  %v270_v49 = vld [vmem:[#allocation2 + $0x228] sm:$0xff] }
  0x26   :  { %442 = vmatpush.msra.mxu2 %v239_v53  ;;  %460 = vmatpush.msra.mxu3 %v257_v54  ;;  %v323_v48 = vld [vmem:[#allocation2 + $0x3d0] sm:$0xff]  ;;  %v288_v50 = vld [vmem:[#allocation2 + $0x2b8] sm:$0xff]  ;;  %v322_v52 = vld [vmem:[#allocation2 + $0x3c8] sm:$0xff] }
  0x27   :  { %405 = vmatpush.msra.mxu0 %v204_v55  ;;  %423 = vmatpush.msra.mxu1 %v222_v56  ;;  %v304_v51 = vld [vmem:[#allocation2 + $0x338] sm:$0xff]  ;;  %v269_v53 = vld [vmem:[#allocation2 + $0x220] sm:$0xff]  ;;  %v287_v54 = vld [vmem:[#allocation2 + $0x2b0] sm:$0xff] }
  0x28   :  { %443 = vmatpush.msra.mxu2 %v238_v57  ;;  %461 = vmatpush.msra.mxu3 %v256_v58  ;;  %v303_v55 = vld [vmem:[#allocation2 + $0x330] sm:$0xff]  ;;  %v321_v56 = vld [vmem:[#allocation2 + $0x3c0] sm:$0xff]  ;;  %v268_v57 = vld [vmem:[#allocation2 + $0x218] sm:$0xff] }
  0x29   :  { %406 = vmatpush.msra.mxu0 %v203_v60  ;;  %424 = vmatpush.msra.mxu1 %v221_v61  ;;  %v286_v58 = vld [vmem:[#allocation2 + $0x2a8] sm:$0xff]  ;;  %v320_v60 = vld [vmem:[#allocation2 + $0x3b8] sm:$0xff]  ;;  %v267_v61 = vld [vmem:[#allocation2 + $0x210] sm:$0xff] }
  0x2a   :  { %444 = vmatpush.msra.mxu2 %v237_v62  ;;  %462 = vmatpush.msra.mxu3 %v255_v0  ;;  %v285_v62 = vld [vmem:[#allocation2 + $0x2a0] sm:$0xff]  ;;  %v319_v0 = vld [vmem:[#allocation2 + $0x3b0] sm:$0xff] }
  0x2b   :  { %832 = vset.pattern.permute.xlu1 %v908_v43  ;;  %407 = vmatpush.msra.mxu0 %v202_v1  ;;  %v306_v43 = vld [vmem:[#allocation2 + $0x348] sm:$0xff] }
  0x2c   :  { %142 = vperm.xlu1 %832, %v955_v3   ;;  %425 = vmatpush.msra.mxu1 %v220_v2  ;;  %v266_v1 = vld [vmem:[#allocation2 + $0x208] sm:$0xff]  ;;  %v284_v2 = vld [vmem:[#allocation2 + $0x298] sm:$0xff] }
  0x2d   :  { %833 = vset.pattern.permute.xlu2 %v909_v47  ;;  %445 = vmatpush.msra.mxu2 %v236_v4  ;;  %v305_v47 = vld [vmem:[#allocation2 + $0x340] sm:$0xff]  ;;  %v300_v4 = vld [vmem:[#allocation2 + $0x318] sm:$0xff] }
  0x2e   :  { %163 = vperm.xlu2 %833, %v955_v3   ;;  %463 = vmatpush.msra.mxu3 %v254_v5  ;;  %v318_v5 = vld [vmem:[#allocation2 + $0x3a8] sm:$0xff] }
  0x2f   :  { %408 = vmatpush.msra.mxu0 %v201_v6  ;;  %426 = vmatpush.msra.mxu1 %v219_v7  ;;  %v265_v6 = vld [vmem:[#allocation2 + $0x200] sm:$0xff]  ;;  %v283_v7 = vld [vmem:[#allocation2 + $0x290] sm:$0xff] }
  0x30   :  { %446 = vmatpush.msra.mxu2 %v235_v8  ;;  %464 = vmatpush.msra.mxu3 %v253_v9  ;;  %v299_v8 = vld [vmem:[#allocation2 + $0x310] sm:$0xff]  ;;  %v317_v9 = vld [vmem:[#allocation2 + $0x3a0] sm:$0xff] }
  0x31   :  { %473 = vmatpush.msrb.mxu0 %v280_v10  ;;  %427 = vmatpush.msra.mxu1 %v218_v11  ;;  %v282_v10 = vld [vmem:[#allocation2 + $0x288] sm:$0xff] }
  0x32   :  { %447 = vmatpush.msra.mxu2 %v234_v12  ;;  %837 = vset.pattern.permute.xlu0 %v911_v63  ;;  %v298_v11 = vld [vmem:[#allocation2 + $0x308] sm:$0xff]  ;;  %v316_v12 = vld [vmem:[#allocation2 + $0x398] sm:$0xff] }
  0x33   :  { %474 = vmatpush.msrb.mxu0 %v279_v13  ;;  %428 = vmatpush.msra.mxu1 %v217_v14  ;;  %v297_v13 = vld [vmem:[#allocation2 + $0x300] sm:$0xff]  ;;  %v315_v14 = vld [vmem:[#allocation2 + $0x390] sm:$0xff] }
  0x34   :  { %835 = vset.pattern.permute.xlu1 %v910_v59  ;;  %448 = vmatpush.msra.mxu2 %v233_v15  ;;  %v302_v59 = vld [vmem:[#allocation2 + $0x328] sm:$0xff] }
  0x35   :  { %175 = vperm.xlu1 %835, %v955_v3   ;;  %475 = vmatpush.msrb.mxu0 %v278_v17  ;;  %v314_v15 = vld [vmem:[#allocation2 + $0x388] sm:$0xff] }
  0x36   :  { %836 = vset.pattern.permute.xlu2 %v911_v63  ;;  %493 = vmatpush.msrb.mxu1 %v296_v18  ;;  %v301_v63 = vld [vmem:[#allocation2 + $0x320] sm:$0xff]  ;;  %v41_v18 = vlaneseq }
  0x37   :  { %181 = vperm.xlu2 %836, %v955_v3   ;;  %v252_v3 = vld [vmem:[#allocation2 + $0x198] sm:$0xff]  ;;  %513 = vmatpush.msrb.mxu2 %v312_v19 }
  0x38   :  { %465 = vmatpush.msra.mxu3 %v252_v3  ;;  %476 = vmatpush.msrb.mxu0 %v277_v21  ;;  %v281_v3 = vld [vmem:[#allocation2 + $0x280] sm:$0xff]  ;;  %v975_v21 = vand.u32 127, %v41_v18  ;;  %v350_v18 = vld [vmem:[#allocation2 + $0x4a8] sm:$0xff] }
  0x39   :  { %494 = vmatpush.msrb.mxu1 %v295_v22  ;;  %514 = vmatpush.msrb.mxu2 %v311_v23 }
  0x3a   :  { %466 = vmatpush.msra.mxu3 %v251_v16  ;;  %477 = vmatpush.msrb.mxu0 %v276_v25  ;;  %v313_v16 = vld [vmem:[#allocation2 + $0x380] sm:$0xff]  ;;  %v978_v23 = vadd.s32 128, %v975_v21 }
  0x3b   :  { %495 = vmatpush.msrb.mxu1 %v294_v26  ;;  %515 = vmatpush.msrb.mxu2 %v310_v27  ;;  %v344_v27 = vld [vmem:[#allocation2 + $0x478] sm:$0xff] }
  0x3c   :  { %467 = vmatpush.msra.mxu3 %v250_v20  ;;  %478 = vmatpush.msrb.mxu0 %v275_v29 }
  0x3d   :  { %496 = vmatpush.msrb.mxu1 %v293_v30  ;;  %516 = vmatpush.msrb.mxu2 %v309_v31  ;;  %v912_v30 = vmov 1.0   ;;  %v343_v31 = vld [vmem:[#allocation2 + $0x470] sm:$0xff] }
  0x3e   :  { %468 = vmatpush.msra.mxu3 %v249_v24  ;;  %479 = vmatpush.msrb.mxu0 %v274_v33  ;;  %v981_v24 = vadd.s32 256, %v975_v21  ;;  %v360_v33 = vld [vmem:[#allocation2 + $0x4f8] sm:$0xff] }
  0x3f   :  { %497 = vmatpush.msrb.mxu1 %v292_v34  ;;  %517 = vmatpush.msrb.mxu2 %v308_v35  ;;  %v342_v34 = vld [vmem:[#allocation2 + $0x468] sm:$0xff]  ;;  %v329_v35 = vld [vmem:[#allocation2 + $0x400] sm:$0xff] }
  0x40   :  { %533 = vmatpush.msrb.mxu3 %v328_v28  ;;  %480 = vmatpush.msrb.mxu0 %v273_v37  ;;  %v359_v37 = vld [vmem:[#allocation2 + $0x4f0] sm:$0xff]  ;;  %v365_v28 = vld [vmem:[#allocation2 + $0x520] sm:$0xff] }
  0x41   :  { %498 = vmatpush.msrb.mxu1 %v291_v38  ;;  %518 = vmatpush.msrb.mxu2 %v307_v39  ;;  %v376_v39 = vld [vmem:[#allocation2 + $0x578] sm:$0xff] }
  0x42   :  { %534 = vmatpush.msrb.mxu3 %v327_v32  ;;  %481 = vmatpush.msrb.mxu0 %v272_v41  ;;  %v358_v41 = vld [vmem:[#allocation2 + $0x4e8] sm:$0xff]  ;;  %v383_v32 = vld [vmem:[#allocation2 + $0x5b0] sm:$0xff] }
  0x43   :  { %499 = vmatpush.msrb.mxu1 %v290_v42  ;;  %519 = vmatpush.msrb.mxu2 %v306_v43  ;;  %v375_v42 = vld [vmem:[#allocation2 + $0x570] sm:$0xff]  ;;  %v340_v43 = vld [vmem:[#allocation2 + $0x458] sm:$0xff] }
  0x44   :  { %535 = vmatpush.msrb.mxu3 %v326_v36  ;;  %482 = vmatpush.msrb.mxu0 %v271_v45 }
  0x45   :  { %500 = vmatpush.msrb.mxu1 %v289_v46  ;;  %520 = vmatpush.msrb.mxu2 %v305_v47  ;;  %v374_v46 = vld [vmem:[#allocation2 + $0x568] sm:$0xff]  ;;  %v339_v47 = vld [vmem:[#allocation2 + $0x450] sm:$0xff] }
  0x46   :  { %536 = vmatpush.msrb.mxu3 %v325_v40  ;;  %483 = vmatpush.msrb.mxu0 %v270_v49  ;;  %v341_v40 = vld [vmem:[#allocation2 + $0x460] sm:$0xff] }
  0x47   :  { %501 = vmatpush.msrb.mxu1 %v288_v50  ;;  %521 = vmatpush.msrb.mxu2 %v304_v51  ;;  %v357_v49 = vld [vmem:[#allocation2 + $0x4e0] sm:$0xff]  ;;  %v338_v51 = vld [vmem:[#allocation2 + $0x448] sm:$0xff] }
  0x48   :  { %537 = vmatpush.msrb.mxu3 %v324_v44  ;;  %484 = vmatpush.msrb.mxu0 %v269_v53  ;;  %v392_v44 = vld [vmem:[#allocation2 + $0x5f8] sm:$0xff]  ;;  %v373_v50 = vld [vmem:[#allocation2 + $0x560] sm:$0xff] }
  0x49   :  { %502 = vmatpush.msrb.mxu1 %v287_v54  ;;  %522 = vmatpush.msrb.mxu2 %v303_v55  ;;  %v356_v53 = vld [vmem:[#allocation2 + $0x4d8] sm:$0xff]  ;;  %v337_v55 = vld [vmem:[#allocation2 + $0x440] sm:$0xff] }
  0x4a   :  { %538 = vmatpush.msrb.mxu3 %v323_v48  ;;  %485 = vmatpush.msrb.mxu0 %v268_v57  ;;  %v391_v48 = vld [vmem:[#allocation2 + $0x5f0] sm:$0xff]  ;;  %v372_v54 = vld [vmem:[#allocation2 + $0x558] sm:$0xff] }
  0x4b   :  { %503 = vmatpush.msrb.mxu1 %v286_v58  ;;  %523 = vmatpush.msrb.mxu2 %v302_v59  ;;  %v355_v58 = vld [vmem:[#allocation2 + $0x4d0] sm:$0xff] }
  0x4c   :  { %539 = vmatpush.msrb.mxu3 %v322_v52  ;;  %486 = vmatpush.msrb.mxu0 %v267_v61  ;;  %v390_v52 = vld [vmem:[#allocation2 + $0x5e8] sm:$0xff]  ;;  %v371_v59 = vld [vmem:[#allocation2 + $0x550] sm:$0xff] }
  0x4d   :  { %504 = vmatpush.msrb.mxu1 %v285_v62  ;;  %524 = vmatpush.msrb.mxu2 %v301_v63  ;;  %v388_v62 = vld [vmem:[#allocation2 + $0x5d8] sm:$0xff]  ;;  %v354_v63 = vld [vmem:[#allocation2 + $0x4c8] sm:$0xff] }
  0x4e   :  { %540 = vmatpush.msrb.mxu3 %v321_v56  ;;  %487 = vmatpush.msrb.mxu0 %v266_v1  ;;  %v389_v56 = vld [vmem:[#allocation2 + $0x5e0] sm:$0xff]  ;;  %v335_v1 = vld [vmem:[#allocation2 + $0x430] sm:$0xff] }
  0x4f   :  { %505 = vmatpush.msrb.mxu1 %v284_v2  ;;  %525 = vmatpush.msrb.mxu2 %v300_v4  ;;  %v387_v2 = vld [vmem:[#allocation2 + $0x5d0] sm:$0xff] }
  0x50   :  { %541 = vmatpush.msrb.mxu3 %v320_v60  ;;  %488 = vmatpush.msrb.mxu0 %v265_v6  ;;  %v336_v60 = vld [vmem:[#allocation2 + $0x438] sm:$0xff]  ;;  %v369_v6 = vld [vmem:[#allocation2 + $0x540] sm:$0xff] }
  0x51   :  { %506 = vmatpush.msrb.mxu1 %v283_v7  ;;  %526 = vmatpush.msrb.mxu2 %v299_v8  ;;  %v334_v7 = vld [vmem:[#allocation2 + $0x428] sm:$0xff] }
  0x52   :  { %542 = vmatpush.msrb.mxu3 %v319_v0  ;;  %v370_v0 = vld [vmem:[#allocation2 + $0x548] sm:$0xff] }
  0x53   :  { %507 = vmatpush.msrb.mxu1 %v282_v10  ;;  %527 = vmatpush.msrb.mxu2 %v298_v11  ;;  %v386_v8 = vld [vmem:[#allocation2 + $0x5c8] sm:$0xff]  ;;  %v368_v10 = vld [vmem:[#allocation2 + $0x538] sm:$0xff]  ;;  %v333_v11 = vld [vmem:[#allocation2 + $0x420] sm:$0xff] }
  0x54   :  { %543 = vmatpush.msrb.mxu3 %v318_v5  ;;  %v353_v5 = vld [vmem:[#allocation2 + $0x4c0] sm:$0xff] }
  0x55   :  { %508 = vmatpush.msrb.mxu1 %v281_v3  ;;  %528 = vmatpush.msrb.mxu2 %v297_v13  ;;  %v351_v13 = vld [vmem:[#allocation2 + $0x4b0] sm:$0xff] }
  0x56   :  { %544 = vmatpush.msrb.mxu3 %v317_v9  ;;  %v352_v9 = vld [vmem:[#allocation2 + $0x4b8] sm:$0xff] }
  0x58   :  { %545 = vmatpush.msrb.mxu3 %v316_v12  ;;  %v385_v12 = vld [vmem:[#allocation2 + $0x5c0] sm:$0xff] }
  0x5a   :  { %546 = vmatpush.msrb.mxu3 %v315_v14  ;;  %v367_v14 = vld [vmem:[#allocation2 + $0x530] sm:$0xff] }
  0x5c   :  { %547 = vmatpush.msrb.mxu3 %v314_v15  ;;  %v332_v15 = vld [vmem:[#allocation2 + $0x418] sm:$0xff] }
  0x5e   :  { %548 = vmatpush.msrb.mxu3 %v313_v16  ;;  %v384_v16 = vld [vmem:[#allocation2 + $0x5b8] sm:$0xff] }
  0x63   :  { %v86_v17 = vpop.permute.xlu2 %85 }
  0x64   :  { %vm87_vm0 = vcmp.eq.s32.totalorder %v975_v21, %v86_v17  ;;  %vm89_vm13 = vcmp.eq.s32.totalorder %v981_v24, %v86_v17 }
  0x6d   :  { %v92_v22 = vpop.permute.xlu2 %91 }
  0x6e   :  { %vm93_vm1 = vcmp.eq.s32.totalorder %v975_v21, %v92_v22  ;;  %vm94_vm6 = vcmp.eq.s32.totalorder %v978_v23, %v92_v22  ;;  %vm95_vm14 = vcmp.eq.s32.totalorder %v981_v24, %v92_v22 }
  0x6f   :  { %vm995_vm12 = vmor %vm87_vm0, %vm93_vm1  ;;  %vm1275_vm1 = vcmp.eq.s32.totalorder %v978_v23, %v86_v17 }
  0x76   :  { %v104_v29 = vpop.permute.xlu2 %103 }
  0x7a   :  { %v59_v19 = vpop.permute.xlu1 %58 }
  0x7b   :  { %v47_v20 = vpop.permute.xlu0 %46  ;;  %vm60_vm7 = vcmp.eq.s32.totalorder %v975_v21, %v59_v19 }
  0x7c   :  { %vm48_vm3 = vcmp.eq.s32.totalorder %v975_v21, %v47_v20  ;;  %vm49_vm15 = vcmp.eq.s32.totalorder %v978_v23, %v47_v20 }
  0x7f   :  { %v1048_v45 = vpop.permute.xlu2 %136 }
  0x83   :  { %v65_v25 = vpop.permute.xlu1 %64 }
  0x84   :  { %v53_v26 = vpop.permute.xlu0 %52  ;;  %vm66_vm4 = vcmp.eq.s32.totalorder %v975_v21, %v65_v25  ;;  %vm67_vm10 = vcmp.eq.s32.totalorder %v978_v23, %v65_v25 }
  0x85   :  { %vm54_vm5 = vcmp.eq.s32.totalorder %v975_v21, %v53_v26  ;;  %vm55_vm8 = vcmp.eq.s32.totalorder %v978_v23, %v53_v26  ;;  %vm72_vm11 = vmor %vm60_vm7, %vm66_vm4  ;;  %vm68_vm7 = vcmp.eq.s32.totalorder %v981_v24, %v65_v25 }
  0x86   :  { %vm69_vm9 = vmor %vm48_vm3, %vm54_vm5  ;;  %vm61_vm3 = vcmp.eq.s32.totalorder %v978_v23, %v59_v19  ;;  %vm56_vm5 = vcmp.eq.s32.totalorder %v981_v24, %v53_v26  ;;  %v331_v26 = vld [vmem:[#allocation2 + $0x410] sm:$0xff] }
  0x87   :  { %vm75_vm2 = vmor %vm69_vm9, %vm72_vm11 }
  0x88   :  { %786 = vmatmul.msk.f32.vlgmr.msra.gmra.mxu0 %vm75_vm2, %v912_v30  ;;  %vm70_vm0 = vmor %vm49_vm15, %vm55_vm8  ;;  %vm50_vm2 = vcmp.eq.s32.totalorder %v981_v24, %v47_v20  ;;  %vm105_vm15 = vcmp.eq.s32.totalorder %v975_v21, %v104_v29  ;;  %v1069_v4 = vpop.permute.xlu2 %163 }
  0x89   :  { %vm1011_vm4 = vmor %vm1275_vm1, %vm94_vm6  ;;  %553 = vmatpush.msra.mxu0 %v344_v27  ;;  %vm62_vm6 = vcmp.eq.s32.totalorder %v981_v24, %v59_v19  ;;  %v366_v19 = vld [vmem:[#allocation2 + $0x528] sm:$0xff]  ;;  %v349_v27 = vld [vmem:[#allocation2 + $0x4a0] sm:$0xff] }
  0x8a   :  { %vm73_vm9 = vmor %vm61_vm3, %vm67_vm10 }
  0x8b   :  { %vm76_vm11 = vmor %vm70_vm0, %vm73_vm9  ;;  %554 = vmatpush.msra.mxu0 %v343_v31 }
  0x8c   :  { %vm1023_vm8 = vmor %vm89_vm13, %vm95_vm14  ;;  %787 = vmatmul.msk.f32.vlgmr.msra.gmra.mxu1 %vm76_vm11, %v912_v30  ;;  %v98_v38 = vpop.permute.xlu1 %97  ;;  %vm106_vm14 = vcmp.eq.s32.totalorder %v978_v23, %v104_v29 }
  0x8d   :  { %vm1031_vm10 = vmor %vm50_vm2, %vm56_vm5  ;;  %573 = vmatpush.msra.mxu1 %v360_v33  ;;  %555 = vmatpush.msra.mxu0 %v342_v34  ;;  %vm99_vm5 = vcmp.eq.s32.totalorder %v975_v21, %v98_v38  ;;  %vm100_vm0 = vcmp.eq.s32.totalorder %v978_v23, %v98_v38  ;;  %vm101_vm9 = vcmp.eq.s32.totalorder %v981_v24, %v98_v38  ;;  %v1067_v61 = vpop.permute.xlu0 %124  ;;  %v348_v33 = vld [vmem:[#allocation2 + $0x498] sm:$0xff] }
  0x8e   :  { %vm74_vm3 = vmor %vm62_vm6, %vm68_vm7  ;;  %vm107_vm7 = vcmp.eq.s32.totalorder %v981_v24, %v104_v29  ;;  %v330_v29 = vld [vmem:[#allocation2 + $0x408] sm:$0xff]  ;;  %v364_v34 = vld [vmem:[#allocation2 + $0x518] sm:$0xff] }
  0x8f   :  { %vm77_vm13 = vmor %vm1031_vm10, %vm74_vm3  ;;  %574 = vmatpush.msra.mxu1 %v359_v37  ;;  %556 = vmatpush.msra.mxu0 %v341_v40  ;;  %vm127_vm3 = vcmp.eq.s32.totalorder %v978_v23, %v1067_v61  ;;  %v382_v37 = vld [vmem:[#allocation2 + $0x5a8] sm:$0xff]  ;;  %v363_v40 = vld [vmem:[#allocation2 + $0x510] sm:$0xff] }
  0x90   :  { %788 = vmatmul.msk.f32.vlgmr.msra.gmra.mxu2 %vm77_vm13, %v912_v30  ;;  %vm111_vm1 = vmor %vm99_vm5, %vm105_vm15 }
  0x91   :  { %593 = vmatpush.msra.mxu2 %v376_v39  ;;  %vm114_vm2 = vmor %vm995_vm12, %vm111_vm1  ;;  %575 = vmatpush.msra.mxu1 %v358_v41  ;;  %v182_v31 = vpop.permute.xlu2 %181  ;;  %v347_v39 = vld [vmem:[#allocation2 + $0x490] sm:$0xff] }
  0x92   :  { %789 = vmatmul.msk.f32.vlgmr.msra.gmra.mxu3 %vm114_vm2, %v912_v30  ;;  %vm112_vm11 = vmor %vm100_vm0, %vm106_vm14  ;;  %557 = vmatpush.msra.mxu0 %v340_v43  ;;  %vm140_vm0 = vcmp.eq.s32.totalorder %v981_v24, %v1048_v45 }
  0x93   :  { %594 = vmatpush.msra.mxu2 %v375_v42  ;;  %vm115_vm6 = vmor %vm1011_vm4, %vm112_vm11  ;;  %613 = vmatpush.msra.mxu3 %v392_v44  ;;  %v381_v42 = vld [vmem:[#allocation2 + $0x5a0] sm:$0xff]  ;;  %v346_v44 = vld [vmem:[#allocation2 + $0x488] sm:$0xff] }
  0x94   :  { %790 = vmatmul.msk.f32.vlgmr.msrb.gmra.mxu0 %vm115_vm6, %v912_v30  ;;  %vm113_vm12 = vmor %vm101_vm9, %vm107_vm7  ;;  %576 = vmatpush.msra.mxu1 %v357_v49  ;;  %vm138_vm7 = vcmp.eq.s32.totalorder %v975_v21, %v1048_v45  ;;  %v361_v49 = vld [vmem:[#allocation2 + $0x500] sm:$0xff] }
  0x95   :  { %vm116_vm10 = vmor %vm1023_vm8, %vm113_vm12  ;;  %595 = vmatpush.msra.mxu2 %v374_v46  ;;  %558 = vmatpush.msra.mxu0 %v339_v47  ;;  %v1065_v57 = vpop.permute.xlu1 %130  ;;  %vm126_vm8 = vcmp.eq.s32.totalorder %v975_v21, %v1067_v61  ;;  %vm139_vm12 = vcmp.eq.s32.totalorder %v978_v23, %v1048_v45  ;;  %v362_v45 = vld [vmem:[#allocation2 + $0x508] sm:$0xff]  ;;  %v380_v47 = vld [vmem:[#allocation2 + $0x598] sm:$0xff] }
  0x96   :  { %791 = vmatmul.msk.f32.vlgmr.msrb.gmra.mxu1 %vm116_vm10, %v912_v30  ;;  %614 = vmatpush.msra.mxu3 %v391_v48  ;;  %vm132_vm4 = vcmp.eq.s32.totalorder %v975_v21, %v1065_v57  ;;  %vm133_vm15 = vcmp.eq.s32.totalorder %v978_v23, %v1065_v57  ;;  %v1110_v25 = vpop.permute.xlu0 %169  ;;  %vm134_vm6 = vcmp.eq.s32.totalorder %v981_v24, %v1065_v57  ;;  %v345_v48 = vld [vmem:[#allocation2 + $0x480] sm:$0xff] }
  0x97   :  { %596 = vmatpush.msra.mxu2 %v373_v50  ;;  %559 = vmatpush.msra.mxu0 %v338_v51  ;;  %vm1087_vm5 = vmor %vm126_vm8, %vm132_vm4  ;;  %vm128_vm10 = vcmp.eq.s32.totalorder %v981_v24, %v1067_v61  ;;  %vm165_vm8 = vcmp.eq.s32.totalorder %v975_v21, %v1069_v4  ;;  %v379_v50 = vld [vmem:[#allocation2 + $0x590] sm:$0xff]  ;;  %v377_v51 = vld [vmem:[#allocation2 + $0x580] sm:$0xff] }
  0x98   :  { %615 = vmatpush.msra.mxu3 %v390_v52  ;;  %577 = vmatpush.msra.mxu1 %v356_v53  ;;  %vm1099_vm1 = vmor %vm127_vm3, %vm133_vm15  ;;  %vm171_vm15 = vcmp.eq.s32.totalorder %v975_v21, %v1110_v25  ;;  %v648_v52 = vld [vmem:[%s1268_s2 + $0x78] sm:$0xff]  ;;  %v646_v53 = vld [vmem:[%s1268_s2 + $0x68] sm:$0xff] }
  0x99   :  { %597 = vmatpush.msra.mxu2 %v372_v54  ;;  %560 = vmatpush.msra.mxu0 %v337_v55  ;;  %v644_v54 = vld [vmem:[%s1268_s2 + $0x58] sm:$0xff]  ;;  %v643_v55 = vld [vmem:[%s1268_s2 + $0x50] sm:$0xff]  ;;  %v641_v57 = vld [vmem:[%s1268_s2 + $0x40] sm:$0xff] }
  0x9a   :  { %616 = vmatpush.msra.mxu3 %v389_v56  ;;  %578 = vmatpush.msra.mxu1 %v355_v58  ;;  %v642_v56 = vld [vmem:[%s1268_s2 + $0x48] sm:$0xff]  ;;  %v640_v58 = vld [vmem:[%s1268_s2 + $0x38] sm:$0xff]  ;;  %v637_v61 = vld [vmem:[%s1268_s2 + $0x20] sm:$0xff] }
  0x9b   :  { %598 = vmatpush.msra.mxu2 %v371_v59  ;;  %561 = vmatpush.msra.mxu0 %v336_v60  ;;  %v639_v59 = vld [vmem:[%s1268_s2 + $0x30] sm:$0xff]  ;;  %v638_v60 = vld [vmem:[%s1268_s2 + $0x28] sm:$0xff] }
  0x9c   :  { %617 = vmatpush.msra.mxu3 %v388_v62  ;;  %579 = vmatpush.msra.mxu1 %v354_v63  ;;  %v636_v62 = vld [vmem:[%s1268_s2 + $0x18] sm:$0xff]  ;;  %v635_v63 = vld [vmem:[%s1268_s2 + $0x10] sm:$0xff] }
  0x9d   :  { %599 = vmatpush.msra.mxu2 %v370_v0  ;;  %562 = vmatpush.msra.mxu0 %v335_v1 }
  0x9e   :  { %618 = vmatpush.msra.mxu3 %v387_v2  ;;  %580 = vmatpush.msra.mxu1 %v353_v5  ;;  %v143_v3 = vpop.permute.xlu1 %142  ;;  %v634_v2 = vld [vmem:[%s1268_s2 + $0x8] sm:$0xff] }
  0x9f   :  { %600 = vmatpush.msra.mxu2 %v369_v6  ;;  %563 = vmatpush.msra.mxu0 %v334_v7  ;;  %vm144_vm13 = vcmp.eq.s32.totalorder %v975_v21, %v143_v3  ;;  %vm146_vm14 = vcmp.eq.s32.totalorder %v981_v24, %v143_v3  ;;  %vm145_vm9 = vcmp.eq.s32.totalorder %v978_v23, %v143_v3  ;;  %v669_v7 = vld [vmem:[%s1269_s3] sm:$0xff] }
  0xa0   :  { %619 = vmatpush.msra.mxu3 %v386_v8  ;;  %581 = vmatpush.msra.mxu1 %v352_v9  ;;  %vm1106_vm2 = vmor %vm140_vm0, %vm146_vm14  ;;  %vm166_vm0 = vcmp.eq.s32.totalorder %v978_v23, %v1069_v4 }
  0xa1   :  { %601 = vmatpush.msra.mxu2 %v368_v10  ;;  %564 = vmatpush.msra.mxu0 %v333_v11  ;;  %vm150_vm11 = vmor %vm138_vm7, %vm144_vm13  ;;  %vm184_vm7 = vcmp.eq.s32.totalorder %v978_v23, %v182_v31 }
  0xa2   :  { %620 = vmatpush.msra.mxu3 %v385_v12  ;;  %582 = vmatpush.msra.mxu1 %v351_v13  ;;  %vm153_vm4 = vmor %vm1087_vm5, %vm150_vm11  ;;  %vm183_vm5 = vcmp.eq.s32.totalorder %v975_v21, %v182_v31  ;;  %vm172_vm11 = vcmp.eq.s32.totalorder %v978_v23, %v1110_v25 }
  0xa3   :  { %602 = vmatpush.msra.mxu2 %v367_v14  ;;  %565 = vmatpush.msra.mxu0 %v332_v15  ;;  %vm151_vm3 = vmor %vm139_vm12, %vm145_vm9 }
  0xa4   :  { %621 = vmatpush.msra.mxu3 %v384_v16  ;;  %583 = vmatpush.msra.mxu1 %v350_v18  ;;  %vm154_vm13 = vmor %vm1099_vm1, %vm151_vm3 }
  0xa5   :  { %603 = vmatpush.msra.mxu2 %v366_v19  ;;  %566 = vmatpush.msra.mxu0 %v331_v26  ;;  %vm1137_vm14 = vmor %vm128_vm10, %vm134_vm6 }
  0xa6   :  { %792 = vmatmul.msk.f32.vlgmr.msrb.gmra.mxu2 %vm153_vm4, %v912_v30  ;;  %584 = vmatpush.msra.mxu1 %v349_v27  ;;  %vm1151_vm1 = vmor %vm165_vm8, %vm171_vm15  ;;  %vm185_vm15 = vcmp.eq.s32.totalorder %v981_v24, %v182_v31 }
  0xa7   :  { %604 = vmatpush.msra.mxu2 %v365_v28  ;;  %793 = vmatmul.msk.f32.vlgmr.msrb.gmra.mxu3 %vm154_vm13, %v912_v30  ;;  %v176_v41 = vpop.permute.xlu1 %175  ;;  %vm155_vm9 = vmor %vm1137_vm14, %vm1106_vm2  ;;  %vm167_vm14 = vcmp.eq.s32.totalorder %v981_v24, %v1069_v4  ;;  %v633_v4 = vld [vmem:[%s1268_s2] sm:$0xff] }
  0xa8   :  { %567 = vmatpush.msra.mxu0 %v330_v29  ;;  %622 = vmatpush.msra.mxu3 %v383_v32  ;;  %vm177_vm6 = vcmp.eq.s32.totalorder %v975_v21, %v176_v41  ;;  %vm178_vm12 = vcmp.eq.s32.totalorder %v978_v23, %v176_v41  ;;  %vm1183_vm4 = vmor %vm166_vm0, %vm172_vm11  ;;  %vm179_vm3 = vcmp.eq.s32.totalorder %v981_v24, %v176_v41  ;;  %v378_v23 = vld [vmem:[#allocation2 + $0x588] sm:$0xff] }
  0xa9   :  { %585 = vmatpush.msra.mxu1 %v348_v33  ;;  %605 = vmatpush.msra.mxu2 %v364_v34  ;;  %vm1167_vm10 = vmor %vm177_vm6, %vm183_vm5  ;;  %vm173_vm5 = vcmp.eq.s32.totalorder %v981_v24, %v1110_v25  ;;  %v647_v24 = vld [vmem:[%s1268_s2 + $0x70] sm:$0xff]  ;;  %v726_v34 = vld [vmem:[%s1270_s4] sm:$0xff]  ;;  %s913_s4 = smov [#allocation5]  }
  0xaa   :  { %568 = vmatpush.msra.mxu0 %v329_v35  ;;  %623 = vmatpush.msra.mxu3 %v382_v37  ;;  %vm1173_vm2 = vmor %vm178_vm12, %vm184_vm7  ;;  %s762_s14 = sshll.u32 %s913_s4, 4  ;;  %s763_s14 = int_to_ptr.vmem [resolvable:$true] %s762_s14 }
  0xab   :  { %794 = vmatmul.msk.f32.vlgmr.msra.gmra.mxu0 %vm155_vm9, %v912_v30  ;;  %586 = vmatpush.msra.mxu1 %v347_v39  ;;  %vm192_vm8 = vmor %vm1151_vm1, %vm1167_vm10  ;;  %vm670_vm9 = vcmask 64512  }
  0xac   :  { %606 = vmatpush.msra.mxu2 %v363_v40  ;;  %624 = vmatpush.msra.mxu3 %v381_v42  ;;  %vm193_vm13 = vmor %vm1183_vm4, %vm1173_vm2 }
  0xad   :  { %587 = vmatpush.msra.mxu1 %v346_v44  ;;  %vm191_vm0 = vmor %vm179_vm3, %vm185_vm15  ;;  %649 = vmatpush.msrb.mxu0 %v648_v52  ;;  %v838_v44 = vld [vmem:[%s1271_s5] ss:$0 sm:$0xff] }
  0xae   :  { %607 = vmatpush.msra.mxu2 %v362_v45  ;;  %625 = vmatpush.msra.mxu3 %v380_v47  ;;  %vm188_vm1 = vmor %vm167_vm14, %vm173_vm5 }
  0xaf   :  { %588 = vmatpush.msra.mxu1 %v345_v48  ;;  %vm194_vm7 = vmor %vm188_vm1, %vm191_vm0  ;;  %650 = vmatpush.msrb.mxu0 %v647_v24 }
  0xb0   :  { %608 = vmatpush.msra.mxu2 %v361_v49  ;;  %626 = vmatpush.msra.mxu3 %v379_v50 }
  0xb1   :  { %795 = vmatmul.msk.f32.vlgmr.msra.gmra.mxu1 %vm192_vm8, %v912_v30  ;;  %796 = vmatmul.msk.f32.vlgmr.msra.gmra.mxu2 %vm193_vm13, %v912_v30 }
  0xb2   :  { %627 = vmatpush.msra.mxu3 %v378_v23  ;;  %696 = vmatpush.msrb.mxu2 %v648_v52 }
  0xb3   :  { %651 = vmatpush.msrb.mxu0 %v646_v53  ;;  %689 = vmatpush.msrb.mxu1 %v669_v7 }
  0xb4   :  { %628 = vmatpush.msra.mxu3 %v377_v51  ;;  %697 = vmatpush.msrb.mxu2 %v647_v24 }
  0xb5   :  { %797 = vmatmul.msk.f32.vlgmr.msra.gmra.mxu3 %vm194_vm7, %v912_v30  ;;  %v645_v30 = vld [vmem:[%s1268_s2 + $0x60] sm:$0xff] }
  0xb6   :  { %698 = vmatpush.msrb.mxu2 %v646_v53  ;;  %652 = vmatpush.msrb.mxu0 %v645_v30 }
  0xb7   :  { %745 = vmatpush.msrb.mxu3 %v726_v34 }
  0xb8   :  { %699 = vmatpush.msrb.mxu2 %v645_v30  ;;  %653 = vmatpush.msrb.mxu0 %v644_v54 }
  0xba   :  { %700 = vmatpush.msrb.mxu2 %v644_v54  ;;  %654 = vmatpush.msrb.mxu0 %v643_v55 }
  0xbc   :  { %701 = vmatpush.msrb.mxu2 %v643_v55  ;;  %655 = vmatpush.msrb.mxu0 %v642_v56 }
  0xbe   :  { %702 = vmatpush.msrb.mxu2 %v642_v56  ;;  %656 = vmatpush.msrb.mxu0 %v641_v57 }
  0xc0   :  { %703 = vmatpush.msrb.mxu2 %v641_v57  ;;  %657 = vmatpush.msrb.mxu0 %v640_v58 }
  0xc2   :  { %704 = vmatpush.msrb.mxu2 %v640_v58  ;;  %658 = vmatpush.msrb.mxu0 %v639_v59 }
  0xc4   :  { %705 = vmatpush.msrb.mxu2 %v639_v59  ;;  %659 = vmatpush.msrb.mxu0 %v638_v60 }
  0xc6   :  { %706 = vmatpush.msrb.mxu2 %v638_v60  ;;  %660 = vmatpush.msrb.mxu0 %v637_v61 }
  0xc8   :  { %707 = vmatpush.msrb.mxu2 %v637_v61  ;;  %661 = vmatpush.msrb.mxu0 %v636_v62 }
  0xca   :  { %708 = vmatpush.msrb.mxu2 %v636_v62  ;;  %662 = vmatpush.msrb.mxu0 %v635_v63 }
  0xcc   :  { %709 = vmatpush.msrb.mxu2 %v635_v63  ;;  %663 = vmatpush.msrb.mxu0 %v634_v2 }
  0xce   :  { %710 = vmatpush.msrb.mxu2 %v634_v2  ;;  %664 = vmatpush.msrb.mxu0 %v633_v4 }
  0xd0   :  { %711 = vmatpush.msrb.mxu2 %v633_v4 }
 0x105   :  { %v410_v0 = vpop.f32.mrf.mxu0 }
 0x109   :  { %v430_v1 = vpop.f32.mrf.mxu1 }
 0x10a   :  { %v431_v6 = vadd.f32 %v430_v1, %v410_v0 }
 0x111   :  { %v490_v11 = vpop.f32.mrf.mxu0 }
 0x113   :  { %v450_v5 = vpop.f32.mrf.mxu2  ;;  %v510_v3 = vpop.f32.mrf.mxu1 }
 0x114   :  { %v451_v9 = vadd.f32 %v450_v5, %v431_v6 }
 0x115   :  { %v470_v8 = vpop.f32.mrf.mxu3 }
 0x116   :  { %v471_v10 = vadd.f32 %v470_v8, %v451_v9 }
 0x118   :  { %v491_v12 = vadd.f32 %v490_v11, %v471_v10 }
 0x11a   :  { %v511_v13 = vadd.f32 %v510_v3, %v491_v12 }
 0x128   :  { %v570_v18 = vpop.f32.mrf.mxu0 }
 0x129   :  { %v530_v14 = vpop.f32.mrf.mxu2 }
 0x12a   :  { %v531_v15 = vadd.f32 %v530_v14, %v511_v13  ;;  %v550_v16 = vpop.f32.mrf.mxu3 }
 0x12c   :  { %v551_v17 = vadd.f32 %v550_v16, %v531_v15 }
 0x12e   :  { %v571_v19 = vadd.f32 %v570_v18, %v551_v17  ;;  %v590_v20 = vpop.f32.mrf.mxu1 }
 0x130   :  { %v591_v22 = vadd.f32 %v590_v20, %v571_v19 }
 0x134   :  { %v610_v25 = vpop.f32.mrf.mxu2 }
 0x135   :  { %v611_v26 = vadd.f32 %v610_v25, %v591_v22 }
 0x138   :  { %v630_v27 = vpop.f32.mrf.mxu3 }
 0x139   :  { %v631_v28 = vadd.f32 %v630_v27, %v611_v26 }
 0x13b   :  { %665 = vmatmul.f32.vlgmr.msrb.gmra.mxu0 %v631_v28 }
 0x1b8   :  { %v666_v29 = vpop.f32.mrf.mxu0 }
 0x1b9   :  { %798 = vmatmul.msk.f32.vlgmr.msrb.gmra.mxu1 %vm670_vm9, %v666_v29 }
 0x236   :  { %v691_v31 = vpop.f32.mrf.mxu1 }
 0x237   :  { %v694_v32 = vsub.f32 %v631_v28, %v691_v31 }
 0x239   :  { %v695_v33 = vmul.f32 %v694_v32, %v694_v32 }
 0x23b   :  { %712 = vmatmul.f32.vlgmr.msrb.gmra.mxu2 %v695_v33 }
 0x2be   :  { %v713_v35 = vpop.f32.mrf.mxu2 }
 0x2bf   :  { %v714_v36 = vadd.f32 1e-12, %v713_v35 }
 0x2c1   :  { %839 = vrsqrt.f32 %v714_v36  ;;  %vm722_vm6 = vweird.f32 %v714_v36 }
 0x2c7   :  { %v840_v37 = vpop.eup %839 }
 0x2c8   :  { %v717_v38 = vmul.f32 %v840_v37, %v714_v36  ;;  %vm723_vm11 = vweird.f32 %v840_v37 }
 0x2c9   :  { %vm724_vm12 = vmor %vm722_vm6, %vm723_vm11 }
 0x2ca   :  { %v718_v39 = vmul.f32 %v840_v37, %v717_v38 }
 0x2cc   :  { %v719_v40 = vmul.f32 0.5, %v718_v39 }
 0x2ce   :  { %v720_v41 = vsub.f32 1.5, %v719_v40 }
 0x2d0   :  { %v721_v42 = vmul.f32 %v840_v37, %v720_v41 }
 0x2d2   :  { %v725_v43 = vsel %vm724_vm12, %v840_v37, %v721_v42 }
 0x2d3   :  { %799 = vmatmul.msk.f32.vlgmr.msrb.gmra.mxu3 %vm670_vm9, %v725_v43 }
 0x356   :  { %v747_v45 = vpop.f32.mrf.mxu3 }
 0x357   :  { %v750_v46 = vmul.f32 %v747_v45, %v694_v32 }
 0x359   :  { %v755_v47 = vadd.f32 %v838_v44, %v750_v46 }
 0x35b   :  { %756 = vst [vmem:[#allocation5] sm:$0xff] %v755_v47 }
 0x35c   :  { %767 = dma.vmem_to_hbm [thread:$0]  %s763_s14, 128, %s765_s17, [#allocation4]  }
 0x35d   :  { %891 = dma.done.wait [#allocation4], 128  }
 0x35e   :  { %892 = vsyncadd [#allocation4], 4294967168 }
 0x35f   :  { %772 = vsyncpa [#allocation3], 1 }
 0x360   :  { %773 = vsyncpa [#allocation4], 1 }

</bundles_post_ra>
